<compile_context>
chip_gen: v5e
topology: v5e:2x2
jax: 0.10.0
libtpu: 0.0.40
codegen_flags: <defaults>
</compile_context>

<pallas_src>
import functools

import jax
import jax.numpy as jnp
from jax.experimental import pallas as pl
from jax.experimental.pallas import tpu as pltpu


def _round_up(x, m):
    return ((x + m - 1) // m) * m


def _focal_kernel(logits_ref, targets_ref, alpha_ref, loss_ref,
                  *, gamma, n_valid, block_cols):
    i = pl.program_id(0)

    x = logits_ref[...].astype(jnp.float32)        # (C, BC)  classes on sublanes
    t = targets_ref[...]                           # (1, BC)  int32 class ids
    a = alpha_ref[...].astype(jnp.float32)         # (C, 1)   per-class weights

    # Numerically stable log-softmax at the target class (log-sum-exp); avoids
    # materializing the full softmax, the reciprocal, and log(probs) -> -inf.
    m = jnp.max(x, axis=0, keepdims=True)                              # (1, BC)
    lse = jnp.log(jnp.sum(jnp.exp(x - m), axis=0, keepdims=True))      # (1, BC)

    # One-hot class mask built from target indices (class axis = sublanes).
    row = jax.lax.broadcasted_iota(jnp.int32, x.shape, 0)              # (C, BC)
    onehot = (row == t).astype(jnp.float32)                            # (C, BC)

    x_t = jnp.sum(x * onehot, axis=0, keepdims=True)                   # (1, BC)
    alpha_n = jnp.sum(a * onehot, axis=0, keepdims=True)               # (1, BC)

    log_p = (x_t - m) - lse                                            # (1, BC)
    probs = jnp.exp(log_p)                                             # (1, BC)
    q = 1.0 - probs

    # Integer-gamma fast path: a short multiply chain on the VPU instead of
    # jnp.power's exp(gamma*log(.)) pair of EUP transcendentals.
    if float(gamma) == int(gamma) and int(gamma) >= 0:
        pw = jnp.ones_like(q)
        for _ in range(int(gamma)):
            pw = pw * q
    else:
        pw = jnp.power(q, jnp.float32(gamma))

    loss = -alpha_n * pw * log_p                                       # (1, BC)

    # Zero out the padded tail columns so the JAX-side sum is exact.
    col = jax.lax.broadcasted_iota(jnp.int32, (1, block_cols), 1) + i * block_cols
    valid = (col < n_valid).astype(jnp.float32)
    loss_ref[...] = loss * valid


def focal_loss2(inputs, targets, alpha=None, gamma=2.0, size_average=True,
                block_cols=None):
    """inputs: (N, C) float logits; targets: (N,) int class ids."""
    N, C = inputs.shape
    if alpha is None:
        alpha = jnp.ones((C,), dtype=jnp.float32)      # matches torch.ones(class_num, 1)
    alpha_col = jnp.asarray(alpha, jnp.float32).reshape(C, 1)

    # Lane-dense column tile: multiple of 128, large enough to amortize the
    # ~0.35 us per-grid-step overhead, capped well below VMEM limits
    # (C * 2048 * 4B * 2 buffers ~ 160 KiB for C=10).
    if block_cols is None:
        block_cols = min(_round_up(N, 128), 2048)
    assert block_cols % 128 == 0
    n_pad = _round_up(N, block_cols)
    num_blocks = n_pad // block_cols

    # Transpose to (C, N) so the batch fills all 128 lanes; pad the tail.
    logits_t = jnp.pad(inputs.astype(jnp.float32).T, ((0, 0), (0, n_pad - N)))
    targets_row = jnp.pad(targets.astype(jnp.int32).reshape(1, N),
                          ((0, 0), (0, n_pad - N)))

    kernel = functools.partial(
        _focal_kernel, gamma=float(gamma), n_valid=N, block_cols=block_cols)

    per_example = pl.pallas_call(
        kernel,
        out_shape=jax.ShapeDtypeStruct((1, n_pad), jnp.float32),
        grid_spec=pltpu.PrefetchScalarGridSpec(
            num_scalar_prefetch=0,
            grid=(num_blocks,),
            in_specs=[
                pl.BlockSpec((C, block_cols), lambda i: (0, i)),  # logits (C, BC)
                pl.BlockSpec((1, block_cols), lambda i: (0, i)),  # targets row
                pl.BlockSpec((C, 1), lambda i: (0, 0)),           # alpha (resident)
            ],
            out_specs=pl.BlockSpec((1, block_cols), lambda i: (0, i)),
        ),
        compiler_params=pltpu.CompilerParams(
            dimension_semantics=("parallel",)),
    )(logits_t, targets_row, alpha_col)

    total = jnp.sum(per_example)           # tiny N-element reduction in plain JAX
    if size_average:
        return total / jnp.float32(N)
    return total


def _reference(inputs, targets, alpha, gamma, size_average):
    p = jax.nn.softmax(inputs.astype(jnp.float32), axis=1)
    mask = jax.nn.one_hot(targets, inputs.shape[1], dtype=jnp.float32)
    probs = jnp.sum(p * mask, axis=1)
    alpha_n = alpha[targets]
    batch_loss = -alpha_n * jnp.power(1.0 - probs, gamma) * jnp.log(probs)
    return jnp.mean(batch_loss) if size_average else jnp.sum(batch_loss)


if __name__ == "__main__":
    class_num = 10
    N = 64
    gamma = 2.0

    key = jax.random.PRNGKey(0)
    k1, k2 = jax.random.split(key)
    logits = jax.random.normal(k1, (N, class_num), dtype=jnp.float32)
    targets = jax.random.randint(k2, (N,), 0, class_num, dtype=jnp.int32)
    alpha = jnp.ones((class_num,), dtype=jnp.float32)

    loss = focal_loss2(logits, targets, alpha=alpha, gamma=gamma,
                       size_average=True)
    loss = jax.block_until_ready(loss)

    ref = _reference(logits, targets, alpha, gamma, True)
    assert jnp.allclose(loss, ref, rtol=1e-5, atol=1e-5), (loss, ref)
    print("KERNEL_OK")
</pallas_src>

<mosaic_0001>
module attributes {stable_mosaic.version = 11 : i64} {
  func.func @_focal_kernel(%arg0: i32, %arg1: memref<10x128xf32, #tpu.memory_space<vmem>>, %arg2: memref<1x128xi32, #tpu.memory_space<vmem>>, %arg3: memref<10x1xf32, #tpu.memory_space<vmem>>, %arg4: memref<1x128xf32, #tpu.memory_space<vmem>>) attributes {dimension_semantics = [#tpu.dimension_semantics<parallel>], iteration_bounds = array<i64: 1>, scalar_prefetch = 0 : i64, scratch_operands = 0 : i64, tpu.core_type = #tpu.core_type<tc>, window_params = [{transform_indices = @transform_0, window_bounds = array<i64: 10, 128>}, {transform_indices = @transform_1, window_bounds = array<i64: 1, 128>}, {pipeline_mode = #tpu.pipeline_mode<synchronous>, transform_indices = @transform_2, window_bounds = array<i64: 10, 1>}, {transform_indices = @transform_3, window_bounds = array<i64: 1, 128>}]} {
    %c0 = arith.constant 0 : index
    %c0_0 = arith.constant 0 : index
    %0 = vector.load %arg1[%c0, %c0_0] : memref<10x128xf32, #tpu.memory_space<vmem>>, vector<10x128xf32>
    %c0_1 = arith.constant 0 : index
    %c0_2 = arith.constant 0 : index
    %1 = vector.load %arg2[%c0_1, %c0_2] : memref<1x128xi32, #tpu.memory_space<vmem>>, vector<1x128xi32>
    %c0_3 = arith.constant 0 : index
    %c0_4 = arith.constant 0 : index
    %2 = vector.load %arg3[%c0_3, %c0_4] : memref<10x1xf32, #tpu.memory_space<vmem>>, vector<10x1xf32>
    %cst = arith.constant dense<0xFF800000> : vector<128xf32>
    %3 = vector.multi_reduction <maximumf>, %0, %cst [0] : vector<10x128xf32> to vector<128xf32>
    %4 = vector.shape_cast %3 : vector<128xf32> to vector<1x128xf32>
    %5 = vector.broadcast %4 : vector<1x128xf32> to vector<10x128xf32>
    %6 = arith.subf %0, %5 : vector<10x128xf32>
    %7 = math.exp %6 : vector<10x128xf32>
    %cst_5 = arith.constant dense<0.000000e+00> : vector<128xf32>
    %8 = vector.multi_reduction <add>, %7, %cst_5 [0] : vector<10x128xf32> to vector<128xf32>
    %9 = vector.shape_cast %8 : vector<128xf32> to vector<1x128xf32>
    %10 = math.log %9 : vector<1x128xf32>
    %11 = tpu.iota {dimensions = array<i32: 0>} : vector<10x128xi32>
    %12 = vector.broadcast %1 : vector<1x128xi32> to vector<10x128xi32>
    %13 = arith.cmpi eq, %11, %12 : vector<10x128xi32>
    %14 = arith.extui %13 : vector<10x128xi1> to vector<10x128xi32>
    %15 = arith.sitofp %14 : vector<10x128xi32> to vector<10x128xf32>
    %16 = arith.mulf %0, %15 : vector<10x128xf32>
    %cst_6 = arith.constant dense<0.000000e+00> : vector<128xf32>
    %17 = vector.multi_reduction <add>, %16, %cst_6 [0] : vector<10x128xf32> to vector<128xf32>
    %18 = vector.shape_cast %17 : vector<128xf32> to vector<1x128xf32>
    %19 = vector.broadcast %2 : vector<10x1xf32> to vector<10x128xf32>
    %20 = arith.mulf %19, %15 : vector<10x128xf32>
    %cst_7 = arith.constant dense<0.000000e+00> : vector<128xf32>
    %21 = vector.multi_reduction <add>, %20, %cst_7 [0] : vector<10x128xf32> to vector<128xf32>
    %22 = vector.shape_cast %21 : vector<128xf32> to vector<1x128xf32>
    %23 = arith.subf %18, %4 : vector<1x128xf32>
    %24 = arith.subf %23, %10 : vector<1x128xf32>
    %25 = math.exp %24 : vector<1x128xf32>
    %cst_8 = arith.constant 1.000000e+00 : f32
    %26 = vector.broadcast %cst_8 : f32 to vector<1x128xf32>
    %27 = arith.subf %26, %25 : vector<1x128xf32>
    %cst_9 = arith.constant 1.000000e+00 : f32
    %28 = vector.broadcast %cst_9 : f32 to vector<1x128xf32>
    %29 = arith.mulf %28, %27 : vector<1x128xf32>
    %30 = arith.mulf %29, %27 : vector<1x128xf32>
    %cst_10 = arith.constant 0.000000e+00 : f32
    %31 = vector.broadcast %cst_10 : f32 to vector<1x128xf32>
    %32 = arith.subf %31, %22 : vector<1x128xf32>
    %33 = arith.mulf %32, %30 : vector<1x128xf32>
    %34 = arith.mulf %33, %24 : vector<1x128xf32>
    %35 = tpu.iota {dimensions = array<i32: 1>} : vector<1x128xi32>
    %c128_i32 = arith.constant 128 : i32
    %36 = arith.muli %arg0, %c128_i32 : i32
    %37 = vector.broadcast %36 : i32 to vector<1x128xi32>
    %38 = arith.addi %35, %37 : vector<1x128xi32>
    %c64_i32 = arith.constant 64 : i32
    %39 = vector.broadcast %c64_i32 : i32 to vector<1x128xi32>
    %40 = arith.cmpi slt, %38, %39 : vector<1x128xi32>
    %41 = arith.extui %40 : vector<1x128xi1> to vector<1x128xi32>
    %42 = arith.sitofp %41 : vector<1x128xi32> to vector<1x128xf32>
    %43 = arith.mulf %34, %42 : vector<1x128xf32>
    %c0_11 = arith.constant 0 : index
    %c0_12 = arith.constant 0 : index
    %44 = vector.load %arg4[%c0_11, %c0_12] : memref<1x128xf32, #tpu.memory_space<vmem>>, vector<1x128xf32>
    tpu.vector_store %arg4[%c0_11, %c0_12], %43 {strides = array<i32>} : memref<1x128xf32, #tpu.memory_space<vmem>>, vector<1x128xf32>,
    return
  }
  func.func @transform_0(%arg0: i32) -> (i32, i32) {
    %c0_i32 = arith.constant 0 : i32
    %c0_i32_0 = arith.constant 0 : i32
    return %c0_i32, %arg0 : i32, i32
  }
  func.func @transform_1(%arg0: i32) -> (i32, i32) {
    %c0_i32 = arith.constant 0 : i32
    %c0_i32_0 = arith.constant 0 : i32
    return %c0_i32, %arg0 : i32, i32
  }
  func.func @transform_2(%arg0: i32) -> (i32, i32) {
    %c0_i32 = arith.constant 0 : i32
    %c0_i32_0 = arith.constant 0 : i32
    %c0_i32_1 = arith.constant 0 : i32
    return %c0_i32, %c0_i32_0 : i32, i32
  }
  func.func @transform_3(%arg0: i32) -> (i32, i32) {
    %c0_i32 = arith.constant 0 : i32
    %c0_i32_0 = arith.constant 0 : i32
    return %c0_i32, %arg0 : i32, i32
  }
}

</mosaic_0001>

<bundles_post_ra>
// kernel: tpu_custom_call.1
= control target key start
LH: loop header
LB: loop body
LE: loop exit
PB: predicated region body
PF: predicated region fallthrough
CT: control target
= control target key end

     0   :  { %v162_v1 = vmov 0   ;;  %s207_s0 = inlined_call_operand.vmem [shape: f32[10,128], index: 0, kind: input, shape index: {}]   ;;  %s208_s1 = inlined_call_operand.vmem [shape: s32[1,128], index: 1, kind: input, shape index: {}]   ;;  %s209_s2 = inlined_call_operand.vmem [shape: f32[10,1], index: 2, kind: input, shape index: {}]   ;;  %s210_s3 = inlined_call_operand.hbm [shape: f32[1,128], index: 3, kind: output, shape index: {}]  }
   0x1   :  { %v19_v0 = vld [vmem:[%s209_s2 + $0x8] sm:$0x3]  ;;  %126 = vset.pattern.permute.xlu0 %v162_v1 }
   0x2   :  { %8 = vsyncpa [#allocation3], 0  ;;  %72 = vperm.xlu0 %126, %v19_v0   ;;  %v18_v2 = vld [vmem:[%s209_s2] sm:$0xff]  ;;  %vm20_vm0 = vcmask 1041408   ;;  %v16_v3 = vld [vmem:[%s207_s0 + $0x8] sm:$0x3]  ;;  %v45_v15 = vlaneseq }
   0x3   :  { %v21_v4 = vsel %vm20_vm0, %v16_v3, -inf  ;;  %v15_v5 = vld [vmem:[%s207_s0] sm:$0xff]  ;;  %v163_v24 = vmov 0.0   ;;  %s164_s0 = smov [#allocation2]   ;;  %s111_s23 = sshll.u32 %s210_s3, 4  ;;  %s112_s23 = int_to_ptr.hbm [resolvable:$true] %s111_s23 }
   0x4   :  { %v22_v6 = vmax.f32 %v15_v5, %v21_v4  ;;  %v46_v18 = vshrl.u32 %v45_v15, 7  ;;  %v127_v21 = vld [vmem:[%s208_s1] ss:$0 sm:$0xff]  ;;  %v95_v62 = vand.u32 127, %v45_v15  ;;  %s109_s1 = sshll.u32 %s164_s0, 4  ;;  %s110_s1 = int_to_ptr.vmem [resolvable:$true] %s109_s1 }
   0x6   :  { %v23_v7 = vrot.slane %v22_v6, 4  ;;  %v47_v20 = vadd.s32 8, %v46_v18  ;;  %vm49_vm2 = vcmp.eq.s32.totalorder %v46_v18, %v127_v21  ;;  %vm99_vm3 = vcmp.lt.s32.totalorder %v95_v62, 64 }
   0x7   :  { %v120_v28 = vsel %vm49_vm2, 1.0, %v163_v24 }
   0x8   :  { %v24_v8 = vmax.f32 %v22_v6, %v23_v7  ;;  %vm50_vm1 = vcmp.eq.s32.totalorder %v47_v20, %v127_v21  ;;  %v55_v30 = vmul.f32 %v120_v28, %v15_v5 }
   0x9   :  { %v121_v25 = vsel %vm50_vm1, 1.0, %v163_v24 }
   0xa   :  { %67 = vperm.xlu0 %126, %v18_v2   ;;  %v25_v9 = vrot.slane %v24_v8, 2  ;;  %v56_v27 = vmul.f32 %v121_v25, %v16_v3 }
   0xc   :  { %v26_v10 = vmax.f32 %v24_v8, %v25_v9  ;;  %v57_v31 = vsel %vm20_vm0, %v56_v27, 0.0 }
   0xd   :  { %v58_v33 = vadd.f32 %v57_v31, %v55_v30 }
   0xe   :  { %v27_v11 = vrot.slane %v26_v10, 1 }
   0xf   :  { %v59_v35 = vrot.slane %v58_v33, 4 }
  0x10   :  { %v28_v12 = vmax.f32 %v26_v10, %v27_v11 }
  0x11   :  { %v60_v37 = vadd.f32 %v59_v35, %v58_v33 }
  0x12   :  { %v30_v13 = vsub.f32 %v16_v3, %v28_v12  ;;  %v29_v14 = vsub.f32 %v15_v5, %v28_v12  ;;  %v122_v3 = vsel %vm99_vm3, 1.0, %v163_v24 }
  0x13   :  { %v61_v39 = vrot.slane %v60_v37, 2 }
  0x14   :  { %v33_v16 = vmul.f32 1.442695, %v30_v13  ;;  %v31_v17 = vmul.f32 1.442695, %v29_v14 }
  0x15   :  { %v62_v41 = vadd.f32 %v61_v39, %v60_v37 }
  0x16   :  { %128 = vpow2.f32 %v33_v16 }
  0x17   :  { %130 = vpow2.f32 %v31_v17  ;;  %v63_v42 = vrot.slane %v62_v41, 1 }
  0x19   :  { %v64_v43 = vadd.f32 %v63_v42, %v62_v41 }
  0x1b   :  { %v85_v46 = vsub.f32 %v64_v43, %v28_v12 }
  0x1c   :  { %v129_v19 = vpop.eup %128 }
  0x1d   :  { %v131_v22 = vpop.eup %130  ;;  %v35_v23 = vsel %vm20_vm0, %v129_v19, 0.0 }
  0x1e   :  { %v36_v26 = vadd.f32 %v131_v22, %v35_v23 }
  0x20   :  { %v37_v29 = vrot.slane %v36_v26, 4 }
  0x22   :  { %v38_v32 = vadd.f32 %v37_v29, %v36_v26 }
  0x24   :  { %v39_v34 = vrot.slane %v38_v32, 2 }
  0x26   :  { %v40_v36 = vadd.f32 %v39_v34, %v38_v32 }
  0x28   :  { %v41_v38 = vrot.slane %v40_v36, 1 }
  0x2a   :  { %v42_v40 = vadd.f32 %v41_v38, %v40_v36 }
  0x2c   :  { %132 = vlog2.f32 %v42_v40 }
  0x32   :  { %v133_v44 = vpop.eup %132 }
  0x33   :  { %v44_v45 = vmul.f32 0.6931472, %v133_v44 }
  0x35   :  { %v86_v48 = vsub.f32 %v85_v46, %v44_v45 }
  0x37   :  { %v87_v50 = vmul.f32 1.442695, %v86_v48 }
  0x39   :  { %134 = vpow2.f32 %v87_v50 }
  0x3f   :  { %v135_v57 = vpop.eup %134 }
  0x40   :  { %v89_v60 = vsub.f32 1.0, %v135_v57 }
  0x42   :  { %v90_v0 = vmul.f32 %v89_v60, %v89_v60 }
  0x74   :  { %v73_v47 = vpop.permute.xlu0 %72 }
  0x75   :  { %v76_v49 = vmul.f32 %v121_v25, %v73_v47 }
  0x77   :  { %v77_v53 = vsel %vm20_vm0, %v76_v49, 0.0 }
  0x7c   :  { %v68_v51 = vpop.permute.xlu0 %67 }
  0x7d   :  { %v75_v52 = vmul.f32 %v120_v28, %v68_v51 }
  0x7f   :  { %v78_v54 = vadd.f32 %v77_v53, %v75_v52 }
  0x81   :  { %v79_v55 = vrot.slane %v78_v54, 4 }
  0x83   :  { %v80_v56 = vadd.f32 %v79_v55, %v78_v54 }
  0x85   :  { %v81_v58 = vrot.slane %v80_v56, 2 }
  0x87   :  { %v82_v59 = vadd.f32 %v81_v58, %v80_v56 }
  0x89   :  { %v83_v61 = vrot.slane %v82_v59, 1 }
  0x8b   :  { %v84_v63 = vadd.f32 %v83_v61, %v82_v59 }
  0x8d   :  { %v91_v1 = vsub.f32 0.0, %v84_v63 }
  0x8f   :  { %v92_v2 = vmul.f32 %v91_v1, %v90_v0 }
  0x91   :  { %v93_v4 = vmul.f32 %v92_v2, %v86_v48 }
  0x93   :  { %v102_v5 = vmul.f32 %v122_v3, %v93_v4 }
  0x95   :  { %103 = vst [vmem:[#allocation2] sm:$0x1] %v102_v5 }
  0x96   :  { %114 = dma.vmem_to_hbm [thread:$0]  %s110_s1, 16, %s112_s23, [#allocation3]  }
  0x97   :  { %160 = dma.done.wait [#allocation3], 16  }
  0x98   :  { %161 = vsyncadd [#allocation3], 4294967280 }
  0x99   :  { %119 = vsyncpa [#allocation3], 1 }

</bundles_post_ra>
